<compile_context>
chip_gen: v6e
topology: v6e:2x2x1
jax: 0.10.0
libtpu: 0.0.40
codegen_flags: <defaults>
</compile_context>

<pallas_src>
import functools

import jax
import jax.numpy as jnp
from jax.experimental import pallas as pl
from jax.experimental.pallas import tpu as pltpu

NUM_CLASSES = 4
FOCAL_ALPHA = 0.25
# FOCAL_GAMMA = 2.0 is hard-coded as pt * pt inside the kernel.
DICE_EPS = 5e-5
W_CLS, W_OBJ, W_MASK, W_DICE = 2.0, 1.0, 5.0, 2.0

IOU_LOGIT_THRESH = -0.4054651081  # log(0.4 / 0.6): sigmoid(x) >= 0.4  <=>  x >= this
NEG_PAD = -1.0e4                  # loss-neutral logit pad: sigmoid ~ 0, BCE(.,0) = 0
MASK_K = 16                       # matched instances per mask-kernel grid step


def _round_up(x, m):
    return ((x + m - 1) // m) * m


def _sigmoid_and_bce_from_exp(x, t):
    """EUP-lean shared math: one exp(-|x|) feeds both sigmoid and stable BCE."""
    e = jnp.exp(-jnp.abs(x))                          # 1 heavy transcendental / element
    r = pl.reciprocal(1.0 + e, approx=True)           # cheap EUP vrcp
    sig = jnp.where(x >= 0.0, r, e * r)               # sigmoid(x)
    bce = jnp.maximum(x, 0.0) - x * t + jnp.log1p(e)  # BCE-with-logits, stable
    return sig, bce


def _bce_with_logits(x, t):
    # plain-JAX helper for the tiny (M,) objectness path in the wrapper
    return jnp.maximum(x, 0.0) - x * t + jnp.log1p(jnp.exp(-jnp.abs(x)))


# ----------------------------------------------------------------------------
# Kernel 1: sigmoid focal loss (sum reduction), lane-dense layout (C_pad, B*N)
# ----------------------------------------------------------------------------
def _focal_kernel(logits_ref, labels_ref, out_ref, *, num_real_classes):
    # logits_ref: (C_pad, TL) f32; queries on the lane axis; padded class rows = NEG_PAD
    # labels_ref: (1, TL) int32; label == num_classes -> background, -1 -> lane padding
    # out_ref   : (n_tiles,) f32 SMEM; per-tile partial sums
    x = logits_ref[...]
    lbl = labels_ref[...]
    cls_iota = jax.lax.broadcasted_iota(jnp.int32, x.shape, 0)
    # One-hot built in-kernel.  Guard cls_iota < num_real_classes so the background
    # label (== num_real_classes) never lights up a padded class row.
    t = jnp.logical_and(cls_iota == lbl, cls_iota < num_real_classes).astype(jnp.float32)
    valid = (lbl >= 0).astype(jnp.float32)            # masks lane padding

    sig, bce = _sigmoid_and_bce_from_exp(x, t)
    pt = (1.0 - sig) * t + sig * (1.0 - t)
    w = (FOCAL_ALPHA * t + (1.0 - FOCAL_ALPHA) * (1.0 - t)) * pt * pt   # gamma == 2

    out_ref[pl.program_id(0)] = jnp.sum(bce * w * valid)


def focal_loss_sum(logits2d, labels1d, num_real_classes):
    BN, C = logits2d.shape
    C_pad = _round_up(max(C, 8), 8)
    BN_pad = _round_up(BN, 128)
    lane_tile = min(BN_pad, 8192)        # single grid step for typical B*N (<= 8192)
    BN_pad = _round_up(BN_pad, lane_tile)
    n_tiles = BN_pad // lane_tile

    logits_t = jnp.pad(logits2d.astype(jnp.float32).T,
                       ((0, C_pad - C), (0, BN_pad - BN)),
                       constant_values=NEG_PAD)       # loss-neutral pad
    labels = jnp.pad(labels1d.astype(jnp.int32)[None, :],
                     ((0, 0), (0, BN_pad - BN)), constant_values=-1)

    n_elem = C_pad * BN_pad
    cost = pl.CostEstimate(flops=20 * n_elem, transcendentals=3 * n_elem,
                           bytes_accessed=4 * n_elem + 4 * BN_pad + 4 * n_tiles)

    grid_spec = pltpu.PrefetchScalarGridSpec(
        num_scalar_prefetch=0,
        grid=(n_tiles,),
        in_specs=[
            pl.BlockSpec((C_pad, lane_tile), lambda j: (0, j)),
            pl.BlockSpec((1, lane_tile), lambda j: (0, j)),
        ],
        out_specs=pl.BlockSpec(memory_space=pltpu.MemorySpace.SMEM),
    )
    partials = pl.pallas_call(
        functools.partial(_focal_kernel, num_real_classes=num_real_classes),
        out_shape=jax.ShapeDtypeStruct((n_tiles,), jnp.float32),
        grid_spec=grid_spec,
        compiler_params=pltpu.CompilerParams(
            dimension_semantics=("arbitrary",),
            vmem_limit_bytes=32 * 1024 * 1024),
        cost_estimate=cost,
    )(logits_t, labels)
    return jnp.sum(partials)


# ----------------------------------------------------------------------------
# Kernel 2: per-matched-instance mask BCE sum, dice loss and mask IoU.
# K = MASK_K instances per grid step on pre-gathered lane-dense rows; batched
# per-row reductions; one lane-dense (K, 128) output block per step.
# ----------------------------------------------------------------------------
def _mask_kernel(src_ref, tgt_ref, out_ref):
    # src_ref: (K, P_pad) f32  mask logits of matched predictions (pad = NEG_PAD)
    # tgt_ref: (K, P_pad) bf16 resized GT masks (pad = 0); upcast to f32 for compute
    # out_ref: (K, 128) f32; lanes [0,1,2] = [bce_sum, dice_loss, mask_iou]
    x = src_ref[...]
    t = tgt_ref[...].astype(jnp.float32)

    s, bce = _sigmoid_and_bce_from_exp(x, t)

    # mask BCE (sum per instance; mean over M*P taken in wrapper).  Padded
    # elements (x=NEG_PAD, t=0) contribute exactly 0.
    bce_sum = jnp.sum(bce, axis=-1, keepdims=True)                  # (K, 1)

    # dice (mmdet DiceLoss, naive_dice=False, sigmoid-activated):
    #   1 - 2*sum(s*t) / ((sum(s*s)+eps) + (sum(t*t)+eps))
    a = jnp.sum(s * t, axis=-1, keepdims=True)
    bc = jnp.sum(s * s + t * t, axis=-1, keepdims=True)             # fused reduction
    dice = 1.0 - 2.0 * a / (bc + 2.0 * DICE_EPS)

    # compute_mask_iou (forward value; stop_gradient applied in wrapper).
    # Threshold in logit space: sigmoid(x) >= 0.4  <=>  x >= log(0.4/0.6).
    bs = (x >= IOU_LOGIT_THRESH).astype(jnp.float32)
    bt = (t > 0.5).astype(jnp.float32)
    inter = jnp.sum(bs * bt, axis=-1, keepdims=True)
    union = jnp.sum(bs + bt, axis=-1, keepdims=True) - inter        # fused reduction
    iou = inter / (union + 1e-6)

    lane = jax.lax.broadcasted_iota(jnp.int32, out_ref.shape, 1)
    res = jnp.where(lane == 0, bce_sum,
          jnp.where(lane == 1, dice,
          jnp.where(lane == 2, iou, 0.0)))
    out_ref[...] = res


def mask_losses_per_instance(src_rows_f32, tgt_rows_bf16):
    # src_rows_f32 : (M_pad, P_pad) f32   pred mask logits, matched & padded
    # tgt_rows_bf16: (M_pad, P_pad) bf16  resized GT masks, matched & padded
    M_pad, P_pad = src_rows_f32.shape
    n_steps = M_pad // MASK_K
    cost = pl.CostEstimate(flops=30 * M_pad * P_pad,
                           transcendentals=2 * M_pad * P_pad,
                           bytes_accessed=M_pad * P_pad * (4 + 2) + M_pad * 128 * 4)

    grid_spec = pltpu.PrefetchScalarGridSpec(
        num_scalar_prefetch=0,
        grid=(n_steps,),
        in_specs=[
            pl.BlockSpec((MASK_K, P_pad), lambda i: (i, 0)),
            pl.BlockSpec((MASK_K, P_pad), lambda i: (i, 0)),
        ],
        out_specs=pl.BlockSpec((MASK_K, 128), lambda i: (i, 0)),
    )
    return pl.pallas_call(
        _mask_kernel,
        out_shape=jax.ShapeDtypeStruct((M_pad, 128), jnp.float32),
        grid_spec=grid_spec,
        compiler_params=pltpu.CompilerParams(
            # Disjoint per-step output blocks -> safe to shard the instance loop
            # across both TensorCores on v7x; no-op on v5e/v6e.
            dimension_semantics=("parallel",),
            vmem_limit_bytes=32 * 1024 * 1024),
        cost_estimate=cost,
    )(src_rows_f32, tgt_rows_bf16)


# ----------------------------------------------------------------------------
# SparseInstCriterion.forward (glue in plain JAX, hot paths in Pallas)
# ----------------------------------------------------------------------------
def sparse_inst_criterion(pred_logits, pred_masks, pred_scores,
                          gt_labels_list, gt_masks_list, indices):
    B, N, C = pred_logits.shape
    Hm, Wm = pred_masks.shape[-2:]
    BN = B * N
    P = Hm * Wm

    # num_instances = reduce_mean over devices (single device -> identity), clamp(min=1)
    num_instances = float(max(sum(int(l.shape[0]) for l in gt_labels_list), 1))

    # ---------------- static match bookkeeping ----------------
    batch_parts, src_parts, lbl_parts, mix_parts = [], [], [], []
    cum = 0
    for b, (src, tgt) in enumerate(indices):
        src_a = jnp.asarray(src, jnp.int32)
        tgt_a = jnp.asarray(tgt, jnp.int32)
        batch_parts.append(jnp.full(src_a.shape, b, jnp.int32))
        src_parts.append(src_a)
        lbl_parts.append(gt_labels_list[b][tgt_a].astype(jnp.int32))
        mix_parts.append(tgt_a + cum)
        cum += int(gt_masks_list[b].shape[0])
    M = sum(len(src) for src, _ in indices)

    # ---------------- classification loss (lane-dense focal kernel) ----------------
    target_classes = jnp.full((BN,), C, dtype=jnp.int32)   # background = num_classes
    if M > 0:
        batch_idx = jnp.concatenate(batch_parts)
        src_idx = jnp.concatenate(src_parts)
        flat_src_idx = batch_idx * N + src_idx
        target_classes = target_classes.at[flat_src_idx].set(jnp.concatenate(lbl_parts))
    loss_cls = W_CLS * focal_loss_sum(pred_logits.reshape(BN, C),
                                      target_classes, C) / num_instances

    total_gt = sum(int(m.shape[0]) for m in gt_masks_list)
    if total_gt == 0 or M == 0:
        zero = jnp.float32(0.0)
        return dict(loss_cls=loss_cls, loss_obj=zero, loss_dice=zero, loss_mask=zero)

    # ---------------- mask / dice / objectness losses ----------------
    mix_tgt_idx = jnp.concatenate(mix_parts)

    # GT masks: concat over batch, bilinear resize to prediction resolution
    # (matches F.interpolate(mode='bilinear', align_corners=False)), gather the
    # matched rows and cast to bf16 in one expression (fuses under jit).
    tgt_all = jnp.concatenate(gt_masks_list, axis=0).astype(jnp.float32)
    tgt_all = jax.image.resize(tgt_all, (tgt_all.shape[0], Hm, Wm),
                               method='bilinear', antialias=False)
    tgt_rows = jnp.take(tgt_all, mix_tgt_idx, axis=0).reshape(M, P).astype(jnp.bfloat16)

    # Pre-gather matched prediction rows (contiguous (M, P) for the kernel).
    src_rows = jnp.take(pred_masks.reshape(BN, Hm, Wm).astype(jnp.float32),
                        flat_src_idx, axis=0).reshape(M, P)

    # Lane-dense, loss-neutral padding: P -> multiple of 128, M -> multiple of MASK_K.
    P_pad = _round_up(P, 128)
    M_pad = _round_up(M, MASK_K)
    src_rows = jnp.pad(src_rows, ((0, M_pad - M), (0, P_pad - P)),
                       constant_values=NEG_PAD)
    tgt_rows = jnp.pad(tgt_rows, ((0, M_pad - M), (0, P_pad - P)),
                       constant_values=0)

    per_inst = mask_losses_per_instance(src_rows, tgt_rows)[:M]   # (M, 128)
    bce_sum = jnp.sum(per_inst[:, 0])
    dice_sum = jnp.sum(per_inst[:, 1])
    ious = jax.lax.stop_gradient(per_inst[:, 2])    # torch.no_grad() path in reference

    # objectness BCE over M scalars: negligible, plain JAX on (M,) arrays
    src_iou_logits = pred_scores[batch_idx, src_idx].reshape(M).astype(jnp.float32)
    obj_sum = jnp.sum(_bce_with_logits(src_iou_logits, ious))

    loss_mask = W_MASK * bce_sum / float(M * P)     # CrossEntropyLoss(sigmoid, mean) * 5.0
    loss_dice = W_DICE * dice_sum / num_instances   # DiceLoss(sum) * 2.0 / num_instances
    loss_obj = W_OBJ * obj_sum / float(M)           # CrossEntropyLoss(sigmoid, mean) * 1.0

    return dict(loss_cls=loss_cls, loss_obj=loss_obj,
                loss_dice=loss_dice, loss_mask=loss_mask)


if __name__ == "__main__":
    key = jax.random.PRNGKey(0)
    B, N, C, H, W = 2, 8, NUM_CLASSES, 16, 16
    Hg, Wg = 2 * H, 2 * W
    k1, k2, k3, k4, k5, k6, k7 = jax.random.split(key, 7)

    pred_logits = jax.random.normal(k1, (B, N, C), jnp.float32)
    pred_masks = jax.random.normal(k2, (B, N, H, W), jnp.float32)
    pred_scores = jax.random.normal(k3, (B, N, 1), jnp.float32)

    # synthetic GT: 3 instances in image 0, 2 in image 1
    gt_labels_list = [
        jax.random.randint(k4, (3,), 0, C, dtype=jnp.int32),
        jax.random.randint(k5, (2,), 0, C, dtype=jnp.int32),
    ]
    gt_masks_list = [
        (jax.random.uniform(k6, (3, Hg, Wg)) > 0.5).astype(jnp.float32),
        (jax.random.uniform(k7, (2, Hg, Wg)) > 0.5).astype(jnp.float32),
    ]

    # deterministic stand-in for the Hungarian assigner output: [(src_idx, tgt_idx), ...]
    indices = [((0, 2, 4), (0, 1, 2)), ((1, 3), (0, 1))]

    losses = sparse_inst_criterion(pred_logits, pred_masks, pred_scores,
                                   gt_labels_list, gt_masks_list, indices)
    jax.block_until_ready(losses)
    print("KERNEL_OK")
</pallas_src>

<mosaic_0001>
module attributes {stable_mosaic.version = 11 : i64} {
  func.func @_focal_kernel(%arg0: i32, %arg1: memref<8x128xf32, #tpu.memory_space<vmem>>, %arg2: memref<1x128xi32, #tpu.memory_space<vmem>>, %arg3: memref<1xf32, #tpu.memory_space<smem>>) attributes {dimension_semantics = [#tpu.dimension_semantics<arbitrary>], iteration_bounds = array<i64: 1>, scalar_prefetch = 0 : i64, scratch_operands = 0 : i64, tpu.core_type = #tpu.core_type<tc>, window_params = [{transform_indices = @transform_0, window_bounds = array<i64: 8, 128>}, {transform_indices = @transform_1, window_bounds = array<i64: 1, 128>}, {transform_indices = @transform_2, window_bounds = array<i64: 1>}]} {
    %c0 = arith.constant 0 : index
    %c0_0 = arith.constant 0 : index
    %0 = vector.load %arg1[%c0, %c0_0] : memref<8x128xf32, #tpu.memory_space<vmem>>, vector<8x128xf32>
    %c0_1 = arith.constant 0 : index
    %c0_2 = arith.constant 0 : index
    %1 = vector.load %arg2[%c0_1, %c0_2] : memref<1x128xi32, #tpu.memory_space<vmem>>, vector<1x128xi32>
    %2 = tpu.iota {dimensions = array<i32: 0>} : vector<8x128xi32>
    %3 = vector.broadcast %1 : vector<1x128xi32> to vector<8x128xi32>
    %4 = arith.cmpi eq, %2, %3 : vector<8x128xi32>
    %c4_i32 = arith.constant 4 : i32
    %5 = vector.broadcast %c4_i32 : i32 to vector<8x128xi32>
    %6 = arith.cmpi slt, %2, %5 : vector<8x128xi32>
    %7 = arith.andi %4, %6 : vector<8x128xi1>
    %8 = arith.extui %7 : vector<8x128xi1> to vector<8x128xi32>
    %9 = arith.sitofp %8 : vector<8x128xi32> to vector<8x128xf32>
    %c0_i32 = arith.constant 0 : i32
    %10 = vector.broadcast %c0_i32 : i32 to vector<1x128xi32>
    %11 = arith.cmpi sge, %1, %10 : vector<1x128xi32>
    %12 = arith.extui %11 : vector<1x128xi1> to vector<1x128xi32>
    %13 = arith.sitofp %12 : vector<1x128xi32> to vector<1x128xf32>
    %14 = math.absf %0 : vector<8x128xf32>
    %cst = arith.constant 0.000000e+00 : f32
    %15 = vector.broadcast %cst : f32 to vector<8x128xf32>
    %16 = arith.subf %15, %14 : vector<8x128xf32>
    %17 = math.exp %16 : vector<8x128xf32>
    %cst_3 = arith.constant 1.000000e+00 : f32
    %18 = vector.broadcast %cst_3 : f32 to vector<8x128xf32>
    %19 = arith.addf %18, %17 : vector<8x128xf32>
    %20 = tpu.reciprocal %19 {approx = true} : vector<8x128xf32> -> vector<8x128xf32>
    %cst_4 = arith.constant 0.000000e+00 : f32
    %21 = vector.broadcast %cst_4 : f32 to vector<8x128xf32>
    %22 = arith.cmpf oge, %0, %21 : vector<8x128xf32>
    %23 = arith.mulf %17, %20 : vector<8x128xf32>
    %24 = arith.select %22, %20, %23 : vector<8x128xi1>, vector<8x128xf32>
    %cst_5 = arith.constant 0.000000e+00 : f32
    %25 = vector.broadcast %cst_5 : f32 to vector<8x128xf32>
    %26 = arith.maximumf %0, %25 : vector<8x128xf32>
    %27 = arith.mulf %0, %9 : vector<8x128xf32>
    %28 = arith.subf %26, %27 : vector<8x128xf32>
    %29 = math.log1p %17 : vector<8x128xf32>
    %30 = arith.addf %28, %29 : vector<8x128xf32>
    %cst_6 = arith.constant 1.000000e+00 : f32
    %31 = vector.broadcast %cst_6 : f32 to vector<8x128xf32>
    %32 = arith.subf %31, %24 : vector<8x128xf32>
    %33 = arith.mulf %32, %9 : vector<8x128xf32>
    %cst_7 = arith.constant 1.000000e+00 : f32
    %34 = vector.broadcast %cst_7 : f32 to vector<8x128xf32>
    %35 = arith.subf %34, %9 : vector<8x128xf32>
    %36 = arith.mulf %24, %35 : vector<8x128xf32>
    %37 = arith.addf %33, %36 : vector<8x128xf32>
    %cst_8 = arith.constant 2.500000e-01 : f32
    %38 = vector.broadcast %cst_8 : f32 to vector<8x128xf32>
    %39 = arith.mulf %38, %9 : vector<8x128xf32>
    %cst_9 = arith.constant 1.000000e+00 : f32
    %40 = vector.broadcast %cst_9 : f32 to vector<8x128xf32>
    %41 = arith.subf %40, %9 : vector<8x128xf32>
    %cst_10 = arith.constant 7.500000e-01 : f32
    %42 = vector.broadcast %cst_10 : f32 to vector<8x128xf32>
    %43 = arith.mulf %42, %41 : vector<8x128xf32>
    %44 = arith.addf %39, %43 : vector<8x128xf32>
    %45 = arith.mulf %44, %37 : vector<8x128xf32>
    %46 = arith.mulf %45, %37 : vector<8x128xf32>
    %47 = arith.mulf %30, %46 : vector<8x128xf32>
    %48 = vector.broadcast %13 : vector<1x128xf32> to vector<8x128xf32>
    %49 = arith.mulf %47, %48 : vector<8x128xf32>
    %50 = vector.shape_cast %49 : vector<8x128xf32> to vector<1x8x128xf32>
    %cst_11 = arith.constant dense<0.000000e+00> : vector<1xf32>
    %51 = vector.multi_reduction <add>, %50, %cst_11 [1, 2] : vector<1x8x128xf32> to vector<1xf32>
    %52 = vector.shape_cast %51 : vector<1xf32> to vector<1x1x1xf32>
    %53 = vector.extract %52[0, 0, 0] : f32 from vector<1x1x1xf32>
    %54 = arith.index_cast %arg0 : i32 to index
    %55 = memref.load %arg3[%54] : memref<1xf32, #tpu.memory_space<smem>>
    memref.store %53, %arg3[%54] : memref<1xf32, #tpu.memory_space<smem>>
    return
  }
  func.func @transform_0(%arg0: i32) -> (i32, i32) {
    %c0_i32 = arith.constant 0 : i32
    %c0_i32_0 = arith.constant 0 : i32
    return %c0_i32, %arg0 : i32, i32
  }
  func.func @transform_1(%arg0: i32) -> (i32, i32) {
    %c0_i32 = arith.constant 0 : i32
    %c0_i32_0 = arith.constant 0 : i32
    return %c0_i32, %arg0 : i32, i32
  }
  func.func @transform_2(%arg0: i32) -> i32 {
    %c0_i32 = arith.constant 0 : i32
    %c0_i32_0 = arith.constant 0 : i32
    return %c0_i32 : i32
  }
}

</mosaic_0001>

<bundles_post_ra>
// kernel: tpu_custom_call.1
= control target key start
LH: loop header
LB: loop body
LE: loop exit
PB: predicated region body
PF: predicated region fallthrough
CT: control target
= control target key end

     0   :  { %7 = vsyncpa [#allocation3], 0  ;;  %s177_s0 = inlined_call_operand.hbm [shape: f32[8,128], index: 0, kind: input, shape index: {}]   ;;  %s178_s1 = inlined_call_operand.vmem [shape: s32[1,128], index: 1, kind: input, shape index: {}]   ;;  %s179_s2 = inlined_call_operand.hbm [shape: f32[1], index: 2, kind: output, shape index: {}]  }
   0x1   :  { %8 = vsyncpa [#allocation4], 0  ;;  %s150_s9 = smov [#allocation2]  }
   0x2   :  { %s15_s10 = sshll.u32 %s150_s9, 4  ;;  %s16_s10 = int_to_ptr.vmem [resolvable:$true] %s15_s10 }
   0x3   :  { %s126_s11 = scalar_lea.vmem %s16_s10, 128  ;;  %p131_p1 = scmp.lt.s32.totalorder %s16_s10, %s16_s10 }
   0x4   :  { %p127_p0 = scmp.ne.s32.totalorder %s16_s10, %s126_s11  ;;  %p132_p2 = scmp.lt.s32.totalorder %s126_s11, %s126_s11 }
   0x6   :  { %p133_p3 = por %p132_p2, %p131_p1 }
   0x8   :  { %p134_p4 = pnand %p133_p3, %p127_p0 }
   0xa   :  { %137 = shalt.err (!%p134_p4)
}
   0xb   :  { %18 = dma.hbm_to_vmem [thread:$0]  %s177_s0, 128, %s16_s10, [#allocation3]  }
   0xc   :  { %146 = dma.done.wait [#allocation3], 128  }
   0xd   :  { %147 = vsyncadd [#allocation3], 4294967168  ;;  %v24_v0 = vld [vmem:[#allocation2] sm:$0xff]  ;;  %v26_v4 = vlaneseq  ;;  %v151_v11 = vmov 0.0  }
   0xe   :  { %v40_v1 = vand.u32 2147483647, %v24_v0  ;;  %v25_v7 = vld [vmem:[%s178_s1] sm:$0x1]  ;;  %vm46_vm3 = vcmp.ge.f32.partialorder %v24_v0, 0.0  ;;  %v49_v20 = vmax.f32 %v24_v0, 0.0 }
   0xf   :  { %v27_v5 = vshrl.u32 %v26_v4, 7  ;;  %vm37_vm5 = vcmp.ge.s32.totalorder %v25_v7, 0  ;;  %s152_s1 = smov [#allocation5]  }
  0x10   :  { %v41_v2 = vsub.f32 0.0, %v40_v1  ;;  %v106_v34 = vsel %vm37_vm5, 1.0, %v151_v11 }
  0x11   :  { %v30_v6 = vsub.s32 0, %v27_v5  ;;  %vm33_vm1 = vcmp.lt.s32.totalorder %v27_v5, 4 }
  0x12   :  { %v42_v3 = vmul.f32 1.442695, %v41_v2 }
  0x13   :  { %v31_v9 = vrot.slane %v25_v7, %v30_v6  ;;  %v77_v38 = vrot.slane %v106_v34, %v30_v6 }
  0x14   :  { %112 = vpow2.f32 %v42_v3 }
  0x15   :  { %vm32_vm0 = vcmp.eq.s32.totalorder %v27_v5, %v31_v9 }
  0x16   :  { %vm34_vm2 = vmand %vm32_vm0, %vm33_vm1 }
  0x17   :  { %v105_v12 = vsel %vm34_vm2, 1.0, %v151_v11 }
  0x18   :  { %v64_v14 = vsub.f32 1.0, %v105_v12  ;;  %v50_v21 = vmul.f32 %v105_v12, %v24_v0  ;;  %v67_v22 = vmul.f32 0.25, %v105_v12 }
  0x1a   :  { %v68_v23 = vmul.f32 0.75, %v64_v14  ;;  %v51_v29 = vsub.f32 %v49_v20, %v50_v21 }
  0x1c   :  { %v69_v31 = vadd.f32 %v68_v23, %v67_v22 }
  0x21   :  { %v113_v8 = vpop.eup %112 }
  0x22   :  { %v44_v10 = vadd.f32 1.0, %v113_v8  ;;  %v55_v13 = vmul.f32 -0.5, %v113_v8  ;;  %v58_v17 = vand.u32 2147483647, %v113_v8 }
  0x24   :  { %114 = vrcp.f32 %v44_v10  ;;  %v56_v15 = vadd.f32 1.0, %v55_v13  ;;  %vm59_vm4 = vcmp.lt.f32.partialorder %v58_v17, 0.0004427343 }
  0x25   :  { %116 = vlog2.f32 %v44_v10 }
  0x26   :  { %v57_v26 = vmul.f32 %v113_v8, %v56_v15 }
  0x31   :  { %v115_v16 = vpop.eup %114 }
  0x32   :  { %v117_v18 = vpop.eup %116  ;;  %v47_v19 = vmul.f32 %v115_v16, %v113_v8 }
  0x33   :  { %v54_v25 = vmul.f32 0.6931472, %v117_v18 }
  0x34   :  { %v48_v24 = vsel %vm46_vm3, %v115_v16, %v47_v19 }
  0x35   :  { %v62_v27 = vsub.f32 1.0, %v48_v24  ;;  %v65_v28 = vmul.f32 %v64_v14, %v48_v24  ;;  %v60_v32 = vsel %vm59_vm4, %v57_v26, %v54_v25 }
  0x36   :  { %v61_v35 = vadd.f32 %v60_v32, %v51_v29 }
  0x37   :  { %v63_v30 = vmul.f32 %v105_v12, %v62_v27 }
  0x39   :  { %v66_v33 = vadd.f32 %v65_v28, %v63_v30 }
  0x3b   :  { %v70_v36 = vmul.f32 %v69_v31, %v66_v33 }
  0x3d   :  { %v71_v37 = vmul.f32 %v70_v36, %v66_v33 }
  0x3f   :  { %v72_v39 = vmul.f32 %v71_v37, %v61_v35 }
  0x41   :  { %v79_v40 = vmul.f32 %v77_v38, %v72_v39 }
  0x43   :  { %80 = vadd.xlane.f32.xlu0 %v79_v40 }
  0xcc   :  { %v81_v41 = vpop.xlane.xlu0 %80 }
  0xcd   :  { %v82_v42 = vrot.slane %v81_v41, 4 }
  0xcf   :  { %v83_v43 = vadd.f32 %v82_v42, %v81_v41 }
  0xd1   :  { %v84_v44 = vrot.slane %v83_v43, 2 }
  0xd3   :  { %v85_v45 = vadd.f32 %v84_v44, %v83_v43 }
  0xd5   :  { %v86_v46 = vrot.slane %v85_v45, 1 }
  0xd7   :  { %v87_v47 = vadd.f32 %v86_v46, %v85_v45 }
  0xd9   :  { %107 = vpush %v87_v47 }
 0x10a   :  { %s108_s0 = spop %107 }
 0x10b   :  { %90 = sst [smem:[#allocation5]] %s108_s0 }
 0x10c   :  { %98 = dma.smem_to_hbm %s152_s1, 16, %s179_s2, [#allocation4]  }
 0x10d   :  { %148 = dma.done.wait [#allocation4], 16  }
 0x10e   :  { %149 = vsyncadd [#allocation4], 4294967280 }
 0x10f   :  { %102 = sfence }
 0x110   :  { %103 = vsyncpa [#allocation3], 1 }
 0x111   :  { %104 = vsyncpa [#allocation4], 1 }

</bundles_post_ra>
